<compile_context>
chip_gen: v7x
topology: tpu7x:2x2x1
jax: 0.10.0
libtpu: 0.0.40
codegen_flags: <defaults>
</compile_context>

<pallas_src>
import jax
import jax.numpy as jnp
from jax.experimental import pallas as pl
from jax.experimental.pallas import tpu as pltpu


def _ceil_to(x: int, m: int) -> int:
    return ((x + m - 1) // m) * m


def _sublane_multiple(dtype) -> int:
    # Native sublane tile: 8 rows for 32-bit, 16 for 16-bit, 32 for 8-bit dtypes.
    return {4: 8, 2: 16, 1: 32}.get(jnp.dtype(dtype).itemsize, 8)


def _corner_block_dims(H: int, W: int, P: int, dtype):
    # Corner block rounded up to the dtype-aware (sublane, 128-lane) tile,
    # clamped to the full dim (a block equal to the full dim is always legal).
    BH = min(H, _ceil_to(P, _sublane_multiple(dtype)))
    BW = min(W, _ceil_to(P, 128))
    return BH, BW


def _pick_batch_tile(B: int, bytes_per_image_block: int) -> int:
    """Largest divisor of B such that per-step buffers stay within a budget
    that fits the smallest scoped-VMEM default (v7x: 32 MiB of 64 MiB physical)
    with multi-buffering, while keeping >= 2 grid steps when B >= 2 so both
    v7x TensorCores get work; on v5e/v6e this means at most 2 fat steps."""
    per_buffer_budget = 4 * 1024 * 1024  # <= ~24 MiB total with 3+3 buffers
    cap = max(1, per_buffer_budget // max(bytes_per_image_block, 1))
    cap = min(cap, 64)
    if B >= 2:
        cap = min(cap, B // 2)
    cap = max(1, min(cap, B))
    tb = 1
    for d in range(1, cap + 1):  # largest divisor of B <= cap (no ragged tail)
        if B % d == 0:
            tb = d
    return tb


def _add_kernel(x_ref, p_ref, o_ref):
    # x_ref / o_ref: (TB, C, BH, BW) block of TB images.
    # p_ref:         (1, C, BH, BW) resident zero-padded patch (constant index
    #                map -> DMA'd once).  Broadcast add along the batch dim ->
    #                one unmasked vld / vadd / vst stream over the whole tile.
    o_ref[...] = x_ref[...] + p_ref[...]


def pad_patch(patch: jax.Array, x_shape, x_dtype, *, in_place: bool = True) -> jax.Array:
    """Zero-pad the (1, C, P, P) patch to the block the kernel consumes.

    Callers that reuse the same patch across many forward calls should call
    this once (per optimizer step) and pass the result as `padded_patch=` to
    keep the pad off the per-call critical path."""
    _, C, H, W = x_shape
    _, Cp, P, P2 = patch.shape
    assert Cp == C and P == P2 and P <= H and P <= W
    if in_place:
        BH, BW = _corner_block_dims(H, W, P, x_dtype)
    else:
        BH, BW = H, W
    p_pad = jnp.zeros((1, C, BH, BW), dtype=x_dtype)
    return p_pad.at[:, :, :P, :P].set(patch.astype(x_dtype))


def padsum(patch: jax.Array) -> jax.Array:
    # Matches FixedPatchPrompter.padsum(); trivial reduction, no kernel needed.
    return jnp.abs(patch).sum()


def fixed_patch_prompter(x: jax.Array, patch: jax.Array, *,
                         in_place: bool = True,
                         padded_patch: jax.Array | None = None) -> jax.Array:
    """out = x + zero_pad(patch) placed at the top-left corner.

    x:     (B, C, H, W)
    patch: (1, C, P, P)

    in_place=True:  the output aliases input 0 (x). The caller MUST donate x
        (jax.jit(..., donate_argnums=(0,))); otherwise XLA inserts a full
        defensive copy of x and the corner-only HBM-traffic win is lost.
    in_place=False: non-aliased fallback that reads/writes every pixel.
    """
    B, C, H, W = x.shape
    _, Cp, P, P2 = patch.shape
    assert Cp == C, "channel mismatch between x and patch"
    assert P == P2, "patch must be square"
    assert P <= H and P <= W, "patch larger than image"
    itemsize = jnp.dtype(x.dtype).itemsize

    if in_place:
        BH, BW = _corner_block_dims(H, W, P, x.dtype)
    else:
        BH, BW = H, W

    if padded_patch is None:
        padded_patch = pad_patch(patch, x.shape, x.dtype, in_place=in_place)
    assert padded_patch.shape == (1, C, BH, BW) and padded_patch.dtype == x.dtype

    # Fold TB images per grid step to amortize the ~0.35 us per-step overhead.
    TB = _pick_batch_tile(B, C * BH * BW * itemsize)
    grid_steps = B // TB

    # Deeper buffering only helps in the tiny-corner-block regime where per-step
    # compute (a handful of vadds) cannot hide the strided corner DMAs.
    deep = in_place and grid_steps >= 3
    pm = {"pipeline_mode": pl.Buffered(3)} if deep else {}

    x_spec = pl.BlockSpec((TB, C, BH, BW), lambda b: (b, 0, 0, 0), **pm)
    out_spec = pl.BlockSpec((TB, C, BH, BW), lambda b: (b, 0, 0, 0), **pm)
    # Patch: constant block index -> fetched once, stays resident across steps.
    p_spec = pl.BlockSpec((1, C, BH, BW), lambda b: (0, 0, 0, 0))

    cost = pl.CostEstimate(
        flops=B * C * BH * BW,
        transcendentals=0,
        bytes_accessed=(2 * B + 1) * C * BH * BW * itemsize,
    )

    return pl.pallas_call(
        _add_kernel,
        out_shape=jax.ShapeDtypeStruct((B, C, H, W), x.dtype),
        grid_spec=pltpu.PrefetchScalarGridSpec(
            num_scalar_prefetch=0,
            grid=(grid_steps,),
            in_specs=[x_spec, p_spec],
            out_specs=out_spec,
        ),
        # NOTE: alias index 0 must stay pinned to x; if scalar-prefetch args are
        # ever added the positional indices shift and the "untouched pixels keep
        # x's values" guarantee would silently break.
        input_output_aliases=({0: 0} if in_place else {}),
        compiler_params=pltpu.CompilerParams(
            dimension_semantics=("parallel",),
        ),
        cost_estimate=cost,
    )(x, padded_patch)


if __name__ == "__main__":
    # Shapes consistent with the module: 3-channel images, isize=16, psize=4.
    # Batch 8 exercises the batch-folding path (TB=4 -> 2 parallel grid steps).
    B, C, ISIZE, PSIZE = 8, 3, 16, 4

    key = jax.random.PRNGKey(0)
    kx, kp = jax.random.split(key)
    x = jax.random.normal(kx, (B, C, ISIZE, ISIZE), dtype=jnp.float32)
    # nn.Parameter(torch.randn([1, 3, psize, psize])) -> randn-like init
    patch = jax.random.normal(kp, (1, C, PSIZE, PSIZE), dtype=jnp.float32)

    # Pure-JAX reference, materialized BEFORE x is donated to the kernel.
    prompt = jnp.zeros((1, C, ISIZE, ISIZE), dtype=jnp.float32)
    prompt = prompt.at[:, :, :PSIZE, :PSIZE].set(patch)
    ref = jax.block_until_ready(x + prompt)

    # 1) Non-aliased fallback (x NOT donated; full-image blocks).
    prompter_copy = jax.jit(lambda xx, pp: fixed_patch_prompter(xx, pp, in_place=False))
    out_copy = jax.block_until_ready(prompter_copy(x, patch))
    assert out_copy.shape == ref.shape and out_copy.dtype == ref.dtype
    assert jnp.allclose(out_copy, ref, atol=1e-6), "fallback mismatch vs reference"

    # 2) In-place corner-only path; donate x so the aliased output reuses its buffer.
    prompter_inplace = jax.jit(
        lambda xx, pp: fixed_patch_prompter(xx, pp, in_place=True),
        donate_argnums=(0,),
    )
    out_inplace = jax.block_until_ready(prompter_inplace(x, patch))
    assert out_inplace.shape == ref.shape and out_inplace.dtype == ref.dtype
    assert jnp.allclose(out_inplace, ref, atol=1e-6), "in-place mismatch vs reference"
    # Explicit checks of regions OUTSIDE the patch corner (alias must preserve x).
    assert jnp.allclose(out_inplace[:, :, PSIZE:, :], ref[:, :, PSIZE:, :]), \
        "rows below the patch were clobbered"
    assert jnp.allclose(out_inplace[:, :, :, PSIZE:], ref[:, :, :, PSIZE:]), \
        "columns right of the patch were clobbered"

    print("KERNEL_OK")
</pallas_src>

<mosaic_0001>
module attributes {stable_mosaic.version = 11 : i64} {
  func.func @_add_kernel(%arg0: i32, %arg1: memref<4x3x16x16xf32, #tpu.memory_space<vmem>>, %arg2: memref<1x3x16x16xf32, #tpu.memory_space<vmem>>, %arg3: memref<4x3x16x16xf32, #tpu.memory_space<vmem>>) attributes {dimension_semantics = [#tpu.dimension_semantics<parallel>], iteration_bounds = array<i64: 2>, scalar_prefetch = 0 : i64, scratch_operands = 0 : i64, tpu.core_type = #tpu.core_type<tc>, window_params = [{transform_indices = @transform_0, window_bounds = array<i64: 4, 3, 16, 16>}, {pipeline_mode = #tpu.pipeline_mode<synchronous>, transform_indices = @transform_1, window_bounds = array<i64: 1, 3, 16, 16>}, {transform_indices = @transform_2, window_bounds = array<i64: 4, 3, 16, 16>}]} {
    %c0 = arith.constant 0 : index
    %c0_0 = arith.constant 0 : index
    %c0_1 = arith.constant 0 : index
    %c0_2 = arith.constant 0 : index
    %0 = vector.load %arg1[%c0, %c0_0, %c0_1, %c0_2] : memref<4x3x16x16xf32, #tpu.memory_space<vmem>>, vector<4x3x16x16xf32>
    %c0_3 = arith.constant 0 : index
    %c0_4 = arith.constant 0 : index
    %c0_5 = arith.constant 0 : index
    %c0_6 = arith.constant 0 : index
    %1 = vector.load %arg2[%c0_3, %c0_4, %c0_5, %c0_6] : memref<1x3x16x16xf32, #tpu.memory_space<vmem>>, vector<1x3x16x16xf32>
    %2 = vector.broadcast %1 : vector<1x3x16x16xf32> to vector<4x3x16x16xf32>
    %3 = arith.addf %0, %2 : vector<4x3x16x16xf32>
    %c0_7 = arith.constant 0 : index
    %c0_8 = arith.constant 0 : index
    %c0_9 = arith.constant 0 : index
    %c0_10 = arith.constant 0 : index
    %4 = vector.load %arg3[%c0_7, %c0_8, %c0_9, %c0_10] : memref<4x3x16x16xf32, #tpu.memory_space<vmem>>, vector<4x3x16x16xf32>
    tpu.vector_store %arg3[%c0_7, %c0_8, %c0_9, %c0_10], %3 {strides = array<i32>} : memref<4x3x16x16xf32, #tpu.memory_space<vmem>>, vector<4x3x16x16xf32>,
    return
  }
  func.func @transform_0(%arg0: i32) -> (i32, i32, i32, i32) {
    %c0_i32 = arith.constant 0 : i32
    %c0_i32_0 = arith.constant 0 : i32
    %c0_i32_1 = arith.constant 0 : i32
    %c0_i32_2 = arith.constant 0 : i32
    return %arg0, %c0_i32, %c0_i32_0, %c0_i32_1 : i32, i32, i32, i32
  }
  func.func @transform_1(%arg0: i32) -> (i32, i32, i32, i32) {
    %c0_i32 = arith.constant 0 : i32
    %c0_i32_0 = arith.constant 0 : i32
    %c0_i32_1 = arith.constant 0 : i32
    %c0_i32_2 = arith.constant 0 : i32
    %c0_i32_3 = arith.constant 0 : i32
    return %c0_i32, %c0_i32_0, %c0_i32_1, %c0_i32_2 : i32, i32, i32, i32
  }
  func.func @transform_2(%arg0: i32) -> (i32, i32, i32, i32) {
    %c0_i32 = arith.constant 0 : i32
    %c0_i32_0 = arith.constant 0 : i32
    %c0_i32_1 = arith.constant 0 : i32
    %c0_i32_2 = arith.constant 0 : i32
    return %arg0, %c0_i32, %c0_i32_0, %c0_i32_1 : i32, i32, i32, i32
  }
}

</mosaic_0001>

<bundles_post_ra>
// kernel: _lambda_.1
= control target key start
LH: loop header
LB: loop body
LE: loop exit
PB: predicated region body
PF: predicated region fallthrough
CT: control target
= control target key end

     0   :  { %7 = vsyncpa [#allocation3], 0  ;;  %s782_s0 = inlined_call_operand.hbm [shape: f32[8,3,16,16], index: 0, kind: input, shape index: {}]   ;;  %s783_s1 = inlined_call_operand.vmem [shape: f32[1,3,16,16], index: 1, kind: input, shape index: {}]   ;;  %s784_s2 = inlined_call_operand.hbm [shape: f32[8,3,16,16], index: 2, kind: output, shape index: {}]  }
   0x1   :  { %9 = vsyncpa [#allocation3 + $0x1], 0 }
   0x2   :  { %10 = vsyncpa [#allocation4], 0 }
   0x3   :  { %12 = vsyncpa [#allocation4 + $0x1], 0  ;;  %s517_s9 = smov 0   ;;  %s519_s10 = smov 0  }
   0x4   :  { %s521_s11 = smov 0   ;;  %s523_s12 = smov 0  }
   0x5 LB: > { %s538_s13 = sadd.s32 4294967295, %s494_s12   ;;  %s332_s14 = sadd.s32 4294967294, %s494_s12   ;;  %s494_s12 = sphi %s523_s12, %s796_s12   ;;  %s490_s11 = sphi %s521_s11, %s795_s11   ;;  %s486_s10 = sphi %s519_s10, %s794_s10   ;;  %s482_s9 = sphi %s517_s9, %s793_s9  }
   0x6   : > { %s542_s15 = sadd.s32 1, %s494_s12   ;;  %s25_s16 = sadd.s32 1, %s490_s11 }
   0x7   : > { %s22_s17 = ssub.s32 %s494_s12, %s542_s15  ;;  %p32_p0 = scmp.ne.s32.totalorder %s490_s11, %s486_s10 }
   0x8   : > { %p23_p1 = scmp.eq.s32.totalorder %s22_s17, 0  ;;  %p33_p2 = scmp.eq.s32.totalorder %s494_s12, 0 }
   0x9   : > { %p38_p3 = scmp.ne.s32.totalorder %s486_s10, %s482_s9  ;;  %p39_p4 = scmp.eq.s32.totalorder %s538_s13, 0 }
   0xa   : > { %s554_s18 = scalar_select %p23_p1, %s490_s11, %s25_s16  }
   0xb   : > { %p34_p5 = por %p33_p2, %p32_p0  ;;  %p556_p6 = por %p39_p4, %p38_p3 }
   0xc   : > { %p83_p7 = scmp.eq.s32.totalorder %s538_s13, 1  ;;  %p89_p8 = scmp.eq.s32.totalorder %s332_s14, 1 }
   0xd   : > { %p360_p10 = scmp.lt.s32.totalorder %s494_s12, 2  ;;  %s112_s22 = sand.u32 1, %s490_s11  }
   0xe   : > { %p563_p11 = por %p83_p7, %p32_p0  ;;  %p567_p12 = por %p89_p8, %p38_p3 }
   0xf   : > { %s345_s23 = smul.u32 3072, %s494_s12  ;;  %p578_p13 = pnand %p360_p10, %p34_p5 }
  0x10   : > { %s787_s20 = scalar_select %p563_p11, 1, 0 }
  0x11   : > { %s788_s21 = scalar_select %p567_p12, 1, 0 }
  0x12   : > { %s344_s24 = smul.u32 192, %s112_s22  ;;  %s576_s27 = scalar_lea.hbm %s782_s0, %s345_s23 }
  0x13   : > { %s584_s3 = scalar_lea.sflag [#allocation3], %s112_s22  ;;  %s398_s4 = scalar_lea.hbm %s576_s27, 3072 }
  0x14   : > { %s116_s29 = scalar_lea.vmem [#allocation2], %s344_s24  ;;  %p399_p0 = scmp.ne.s32.totalorder %s576_s27, %s398_s4 }
  0x15   : > { %s124_s30 = sshll.u32 %s116_s29, 4  ;;  %p400_p1 = pneg %p578_p13  ;;  %s582_s30 = int_to_ptr.vmem [resolvable:$true] %s124_s30 }
  0x16   : > { %s403_s7 = scalar_lea.hbm %s782_s0, 6144  ;;  %p404_p4 = scmp.lt.u32.totalorder %s576_s27, %s782_s0 }
  0x17   : > { %p401_p2 = pnand %p400_p1, %p399_p0  ;;  %p405_p5 = scmp.lt.u32.totalorder %s403_s7, %s398_s4 }
  0x18   : > { %p407_p8 = scmp.lt.u32.totalorder %s398_s4, %s576_s27 }
  0x19   : > { %p402_p3 = pneg %p401_p2  ;;  %p406_p7 = por %p405_p5, %p404_p4 }
  0x1b   : > { %p408_p10 = por %p407_p8, %p406_p7 }
  0x1d   : > { %p409_p9 = pnand %p408_p10, %p402_p3 }
  0x1f   : > { %412 = shalt.err (!%p409_p9)
}
  0x20   : > { %s413_s16 = scalar_lea.vmem %s582_s30, 3072  ;;  %s496_s17 = smov [#allocation2]  }
  0x21   : > { %p414_p0 = scmp.ne.s32.totalorder %s582_s30, %s413_s16  ;;  %s418_s22 = sshll.u32 %s496_s17, 4  ;;  %s419_s22 = int_to_ptr.vmem [resolvable:$false] %s418_s22 }
  0x22   : > { %s420_s23 = scalar_lea.vmem %s419_s22, 6144  ;;  %p421_p11 = scmp.lt.s32.totalorder %s582_s30, %s419_s22 }
  0x23   : > { %p416_p2 = pnand %p414_p0, %p400_p1  ;;  %p422_p4 = scmp.lt.s32.totalorder %s420_s23, %s413_s16 }
  0x25   : > { %p417_p12 = pneg %p416_p2  ;;  %p423_p5 = por %p422_p4, %p421_p11 }
  0x27   : > { %p424_p7 = pnand %p423_p5, %p417_p12 }
  0x29   : > { %427 = shalt.err (!%p424_p7)
}
  0x2a   : > { %s497_s24 = smov 128   ;;  %s498_s25 = smov 8  }
  0x2b   : > { %355 = dma.hbm_to_vmem [thread:$0]  (!%p578_p13), %s576_s27, 3072, %s582_s30, %s584_s3, %s497_s24, %s497_s24, %s498_s25  }
  0x2c   : > { %p338_p9 = scmp.ge.s32.totalorder %s494_s12, 1  ;;  %p132_p1 = scmp.lt.s32.totalorder %s494_s12, 3 }
  0x2e   : > { %p133_p3 = pnand %p338_p9, %p132_p1 }
  0x2f   : > { %s615_s26 = sand.u32 (!%p133_p3), 1, %s486_s10  }
  0x30   : > { %136 = sbr.rel (%p133_p3) target bundleno = 87 (0x57), region = 28  ;;  %s139_s4 = scalar_lea.sflag (!%p133_p3), [#allocation3], %s615_s26 }
  0x31   : > { %s346_s29 = smul.u32 (!%p133_p3), 192, %s615_s26 }
  0x33   : > { %s619_s5 = scalar_lea.vmem (!%p133_p3), [#allocation2], %s346_s29 }
  0x37   : > { %473 = dma.done.wait (%p556_p6), %s139_s4, 3072  }
  0x38   : > { %475 = vsyncadd (%p556_p6), %s139_s4, 4294964224  ;;  %v165_v0 = vld [vmem:[%s619_s5] sm:$0xff]  ;;  %vm219_vm0 = vcmask 130048   ;;  %v166_v2 = vld [vmem:[%s619_s5 + $0x8] sm:$0xff]  ;;  %s647_s14 = scalar_lea.vmem [#allocation5], %s346_s29  ;;  %s347_s24 = smul.u32 3072, %s538_s13 }
  0x39   : > { %v629_v1 = vld [vmem:[%s783_s1] sm:$0xff]  ;;  %v190_v4 = vld [vmem:[%s783_s1 + $0x8] sm:$0xff]  ;;  %v167_v5 = vld [vmem:[%s619_s5 + $0x10] sm:$0xff]  ;;  %s259_s25 = sshll.u32 %s647_s14, 4  ;;  %s245_s27 = scalar_lea.sflag [#allocation4], %s615_s26  ;;  %s712_s25 = int_to_ptr.vmem [resolvable:$true] %s259_s25 }
  0x3a   : > { %v195_v3 = vadd.f32 %v629_v1, %v165_v0  ;;  %v191_v6 = vld [vmem:[%s783_s1 + $0x10] sm:$0xff]  ;;  %v196_v7 = vadd.f32 %v190_v4, %v166_v2  ;;  %v168_v9 = vld [vmem:[%s619_s5 + $0x18] sm:$0xff]  ;;  %v169_v11 = vld [vmem:[%s619_s5 + $0x20] sm:$0xff]  ;;  %s428_s13 = scalar_lea.vmem %s712_s25, 3072  ;;  %p790_p11 = scmp.ne.s32.totalorder %s787_s20, 0 }
  0x3b   : > { %v197_v8 = vadd.f32 %v191_v6, %v167_v5  ;;  %v644_v10 = vld [vmem:[%s783_s1 + $0x18] sm:$0xff]  ;;  %v193_v13 = vld [vmem:[%s783_s1 + $0x20] sm:$0xff]  ;;  %v170_v14 = vld [vmem:[%s619_s5 + $0x28] sm:$0xff]  ;;  %p429_p6 = scmp.ne.s32.totalorder %s712_s25, %s428_s13  ;;  %s499_s28 = smov [#allocation5]  }
  0x3c   : > { %220 = vst.msk [vmem:[%s647_s14] sm:$0xff] %vm219_vm0, %v195_v3  ;;  %v198_v12 = vadd.f32 %v644_v10, %v168_v9  ;;  %v194_v15 = vld [vmem:[%s783_s1 + $0x28] sm:$0xff]  ;;  %221 = vst.msk [vmem:[%s647_s14 + $0x8] sm:$0xff] %vm219_vm0, %v196_v7  ;;  %v199_v16 = vadd.f32 %v193_v13, %v169_v11  ;;  %v171_v18 = vld [vmem:[%s619_s5 + $0x30] sm:$0xff]  ;;  %s432_s30 = sshll.u32 %s499_s28, 4  ;;  %s433_s30 = int_to_ptr.vmem [resolvable:$false] %s432_s30 }
  0x3d   : > { %222 = vst.msk [vmem:[%s647_s14 + $0x10] sm:$0xff] %vm219_vm0, %v197_v8  ;;  %v200_v17 = vadd.f32 %v194_v15, %v170_v14  ;;  %v172_v19 = vld [vmem:[%s619_s5 + $0x38] sm:$0xff]  ;;  %v173_v20 = vld [vmem:[%s619_s5 + $0x40] sm:$0xff]  ;;  %v201_v21 = vadd.f32 %v629_v1, %v171_v18  ;;  %v174_v24 = vld [vmem:[%s619_s5 + $0x48] sm:$0xff]  ;;  %p430_p12 = pnand %p429_p6, %p790_p11  ;;  %s434_s3 = scalar_lea.vmem %s433_s30, 6144 }
  0x3e   : > { %223 = vst.msk [vmem:[%s647_s14 + $0x18] sm:$0xff] %vm219_vm0, %v198_v12  ;;  %v202_v22 = vadd.f32 %v190_v4, %v172_v19  ;;  %v203_v23 = vadd.f32 %v191_v6, %v173_v20  ;;  %v175_v25 = vld [vmem:[%s619_s5 + $0x50] sm:$0xff]  ;;  %v176_v26 = vld [vmem:[%s619_s5 + $0x58] sm:$0xff]  ;;  %224 = vst.msk [vmem:[%s647_s14 + $0x20] sm:$0xff] %vm219_vm0, %v199_v16  ;;  %v204_v27 = vadd.f32 %v644_v10, %v174_v24  ;;  %p435_p8 = scmp.lt.s32.totalorder %s712_s25, %s433_s30  ;;  %p436_p10 = scmp.lt.s32.totalorder %s434_s3, %s428_s13 }
  0x3f   : > { %225 = vst.msk [vmem:[%s647_s14 + $0x28] sm:$0xff] %vm219_vm0, %v200_v17  ;;  %v205_v28 = vadd.f32 %v193_v13, %v175_v25  ;;  %v206_v29 = vadd.f32 %v194_v15, %v176_v26  ;;  %v177_v30 = vld [vmem:[%s619_s5 + $0x60] sm:$0xff]  ;;  %v178_v31 = vld [vmem:[%s619_s5 + $0x68] sm:$0xff]  ;;  %v179_v32 = vld [vmem:[%s619_s5 + $0x70] sm:$0xff]  ;;  %p431_p13 = pneg %p430_p12 }
  0x40   : > { %226 = vst.msk [vmem:[%s647_s14 + $0x30] sm:$0xff] %vm219_vm0, %v201_v21  ;;  %227 = vst.msk [vmem:[%s647_s14 + $0x38] sm:$0xff] %vm219_vm0, %v202_v22  ;;  %v207_v33 = vadd.f32 %v629_v1, %v177_v30  ;;  %v208_v34 = vadd.f32 %v190_v4, %v178_v31  ;;  %v209_v35 = vadd.f32 %v191_v6, %v179_v32  ;;  %v180_v36 = vld [vmem:[%s619_s5 + $0x78] sm:$0xff]  ;;  %v181_v37 = vld [vmem:[%s619_s5 + $0x80] sm:$0xff]  ;;  %p437_p0 = por %p436_p10, %p435_p8 }
  0x41   : > { %228 = vst.msk [vmem:[%s647_s14 + $0x40] sm:$0xff] %vm219_vm0, %v203_v23  ;;  %v182_v38 = vld [vmem:[%s619_s5 + $0x88] sm:$0xff]  ;;  %229 = vst.msk [vmem:[%s647_s14 + $0x48] sm:$0xff] %vm219_vm0, %v204_v27  ;;  %v210_v39 = vadd.f32 %v644_v10, %v180_v36  ;;  %v211_v40 = vadd.f32 %v193_v13, %v181_v37  ;;  %v183_v42 = vld [vmem:[%s619_s5 + $0x90] sm:$0xff] }
  0x42   : > { %230 = vst.msk [vmem:[%s647_s14 + $0x50] sm:$0xff] %vm219_vm0, %v205_v28  ;;  %231 = vst.msk [vmem:[%s647_s14 + $0x58] sm:$0xff] %vm219_vm0, %v206_v29  ;;  %v212_v41 = vadd.f32 %v194_v15, %v182_v38  ;;  %v184_v43 = vld [vmem:[%s619_s5 + $0x98] sm:$0xff]  ;;  %v185_v44 = vld [vmem:[%s619_s5 + $0xa0] sm:$0xff]  ;;  %v213_v45 = vadd.f32 %v629_v1, %v183_v42  ;;  %p438_p2 = pnand %p437_p0, %p431_p13 }
  0x43   : > { %232 = vst.msk [vmem:[%s647_s14 + $0x60] sm:$0xff] %vm219_vm0, %v207_v33  ;;  %233 = vst.msk [vmem:[%s647_s14 + $0x68] sm:$0xff] %vm219_vm0, %v208_v34  ;;  %v214_v46 = vadd.f32 %v190_v4, %v184_v43  ;;  %v215_v47 = vadd.f32 %v191_v6, %v185_v44  ;;  %v186_v48 = vld [vmem:[%s619_s5 + $0xa8] sm:$0xff]  ;;  %v187_v49 = vld [vmem:[%s619_s5 + $0xb0] sm:$0xff] }
  0x44   : > { %234 = vst.msk [vmem:[%s647_s14 + $0x70] sm:$0xff] %vm219_vm0, %v209_v35  ;;  %v188_v50 = vld [vmem:[%s619_s5 + $0xb8] sm:$0xff]  ;;  %235 = vst.msk [vmem:[%s647_s14 + $0x78] sm:$0xff] %vm219_vm0, %v210_v39  ;;  %v216_v51 = vadd.f32 %v644_v10, %v186_v48  ;;  %v217_v52 = vadd.f32 %v193_v13, %v187_v49  ;;  %s726_s5 = scalar_lea.hbm %s784_s2, %s347_s24 }
  0x45   : > { %236 = vst.msk [vmem:[%s647_s14 + $0x80] sm:$0xff] %vm219_vm0, %v211_v40  ;;  %237 = vst.msk [vmem:[%s647_s14 + $0x88] sm:$0xff] %vm219_vm0, %v212_v41  ;;  %v218_v53 = vadd.f32 %v194_v15, %v188_v50 }
  0x46   : > { %238 = vst.msk [vmem:[%s647_s14 + $0x90] sm:$0xff] %vm219_vm0, %v213_v45  ;;  %239 = vst.msk [vmem:[%s647_s14 + $0x98] sm:$0xff] %vm219_vm0, %v214_v46 }
  0x47   : > { %240 = vst.msk [vmem:[%s647_s14 + $0xa0] sm:$0xff] %vm219_vm0, %v215_v47  ;;  %241 = vst.msk [vmem:[%s647_s14 + $0xa8] sm:$0xff] %vm219_vm0, %v216_v51 }
  0x48   : > { %242 = vst.msk [vmem:[%s647_s14 + $0xb0] sm:$0xff] %vm219_vm0, %v217_v52  ;;  %243 = vst.msk [vmem:[%s647_s14 + $0xb8] sm:$0xff] %vm219_vm0, %v218_v53 }
  0x49   : > { %441 = shalt.err (!%p438_p2)
}
  0x4a   : > { %s442_s19 = scalar_lea.hbm %s726_s5, 3072  ;;  %s446_s8 = scalar_lea.hbm %s784_s2, 6144 }
  0x4b   : > { %p443_p4 = scmp.ne.s32.totalorder %s726_s5, %s442_s19  ;;  %p447_p9 = scmp.lt.u32.totalorder %s726_s5, %s784_s2 }
  0x4c   : > { %p448_p1 = scmp.lt.u32.totalorder %s446_s8, %s442_s19  ;;  %p450_p6 = scmp.lt.u32.totalorder %s442_s19, %s726_s5 }
  0x4d   : > { %p444_p5 = pnand %p443_p4, %p790_p11 }
  0x4e   : > { %p449_p3 = por %p448_p1, %p447_p9 }
  0x4f   : > { %p445_p7 = pneg %p444_p5 }
  0x50   : > { %p451_p12 = por %p450_p6, %p449_p3 }
  0x52   : > { %p452_p13 = pnand %p451_p12, %p445_p7 }
  0x54   : > { %455 = shalt.err (!%p452_p13)
}
  0x55   : > { %s500_s17 = smov 128   ;;  %s501_s22 = smov 8  }
  0x56   : > { %350 = dma.vmem_to_hbm [thread:$0]  (%p790_p11), %s712_s25, 3072, %s726_s5, %s245_s27, %s500_s17, %s500_s17, %s501_s22  }
  0x57 PF: > { %s274_s23 = sand.u32 1, %s482_s9   ;;  %p791_p8 = scmp.ne.s32.totalorder %s788_s21, 0 }
  0x58   : > { %p792_p10 = scmp.ge.s32.totalorder %s494_s12, 2  ;;  %s275_s24 = scalar_lea.sflag [#allocation4], %s274_s23 }
  0x5a   : > { %p357_p0 = pnand %p792_p10, %p791_p8 }
  0x5c   : > { %477 = dma.done.wait (!%p357_p0), %s275_s24, 3072  }
  0x5d   : > { %479 = vsyncadd (!%p357_p0), %s275_s24, 4294964224  ;;  %p15_p2 = scmp.ge.s32.totalorder %s542_s15, 4   ;;  %s793_s9 = smov %s486_s10 }
  0x5e   : > { %s794_s10 = smov %s490_s11  ;;  %s795_s11 = smov %s554_s18 }
  0x5f   : > { %s796_s12 = smov %s542_s15  ;;  %17 = sbr.rel (!%p15_p2) target bundleno = 5 (0x5), region = 73 }
  0x66   :  { %280 = vsyncpa [#allocation3], 1 }
  0x67   :  { %282 = vsyncpa [#allocation3 + $0x1], 1 }
  0x68   :  { %283 = vsyncpa [#allocation4], 1 }
  0x69   :  { %285 = vsyncpa [#allocation4 + $0x1], 1 }

</bundles_post_ra>
